<compile_context>
chip_gen: v7x
topology: tpu7x:2x2x1
jax: 0.10.0
libtpu: 0.0.40
codegen_flags: <defaults>
</compile_context>

<pallas_src>
import math

import jax
import jax.numpy as jnp
from jax.experimental import pallas as pl
from jax.experimental.pallas import tpu as pltpu

_LANE = 128
_MAX_BLOCK_ROWS_F32 = 4096    # 2 MiB f32 input tile
_MAX_BLOCK_ROWS_BF16 = 8192   # 2 MiB bf16 input tile
_NUM_CORES = 2                # v7x: 2 TensorCores; extra loop iter elsewhere
_VMEM_LIMIT_BYTES = 32 * 1024 * 1024


def _make_kernel(*, t, eps, clip_value, lower_bound, up_bound,
                 block_rows, blocks_per_core, full_blocks, rows,
                 needs_mask_path):
    t = float(t)
    eps = float(eps)
    clip_value = float(clip_value)
    lower_bound = float(lower_bound)
    up_bound = float(up_bound)
    neg_inv_t = -1.0 / t
    thresh = -1.0 / (t * t)                           # determine: z <= -1/t^2
    const = -math.log(1.0 / (t * t)) / t + 1.0 / t    # constant of linear branch

    def barrier(z):
        left = jnp.log(jnp.abs(z) + eps) * neg_inv_t  # -log(|z|+eps)/t
        right = t * z + const                         # t*z - log(1/t^2)/t + 1/t
        return jnp.where(z <= thresh, left, right)

    def kernel(pred_ref, targ_ref, out_ref):
        c = pl.program_id(0)   # core (parallel) axis
        i = pl.program_id(1)   # reduction (arbitrary) axis

        @pl.when(i == 0)
        def _():
            out_ref[...] = jnp.zeros_like(out_ref)

        p = pred_ref[...].astype(jnp.float32)
        g = targ_ref[...].astype(jnp.float32)

        lower_barrier = lower_bound * g - p
        up_barrier = p - up_bound * g
        res = barrier(lower_barrier) + barrier(up_barrier)
        res = jnp.clip(res, -clip_value, clip_value)

        if not needs_mask_path:
            # Every block is fully valid: plain per-lane accumulation.
            out_ref[...] += jnp.sum(res, axis=0, keepdims=True)
        else:
            gb = c * blocks_per_core + i        # global, UNclamped block index
            is_full = gb < full_blocks

            @pl.when(is_full)
            def _():
                # Fast path (all but the boundary/overflow blocks).
                out_ref[...] += jnp.sum(res, axis=0, keepdims=True)

            @pl.when(jnp.logical_not(is_full))
            def _():
                # Ragged last block: mask undefined rows (mask AFTER clip and
                # BEFORE the sum so garbage/NaN rows are selected away).
                # Overflow blocks from the core split get valid <= 0 -> zero.
                valid = rows - gb * block_rows
                row_ids = jax.lax.broadcasted_iota(jnp.int32, res.shape, 0)
                masked = jnp.where(row_ids < valid, res, 0.0)
                out_ref[...] += jnp.sum(masked, axis=0, keepdims=True)

    return kernel


def log_barrier_loss(predict, target, *, t=1.0, bound_ratio=0.1,
                     eps=1e-4, clip_value=100.0, max_block_rows=None):
    """Pallas implementation of LogBarrierLoss.forward (t == t_0 unless retraced)."""
    assert predict.shape == target.shape
    total = int(math.prod(predict.shape))

    def prep(x):
        x = jnp.asarray(x)
        if x.dtype not in (jnp.float32, jnp.bfloat16):
            x = x.astype(jnp.float32)
        return x.reshape(-1)

    pred_flat = prep(predict)
    targ_flat = prep(target)

    pad = (-total) % _LANE
    if pad:
        # Only when numel % 128 != 0 (pads < 128 zeros; their contribution is
        # subtracted analytically below, so no in-kernel per-element mask).
        pred_flat = jnp.pad(pred_flat, (0, pad))
        targ_flat = jnp.pad(targ_flat, (0, pad))
    rows = (total + pad) // _LANE

    pred2 = pred_flat.reshape(rows, _LANE)   # metadata-only reshape
    targ2 = targ_flat.reshape(rows, _LANE)

    if max_block_rows is None:
        both_bf16 = (pred2.dtype == jnp.bfloat16 and targ2.dtype == jnp.bfloat16)
        max_block_rows = _MAX_BLOCK_ROWS_BF16 if both_bf16 else _MAX_BLOCK_ROWS_F32

    block_rows = min(rows, int(max_block_rows))
    if block_rows < rows and block_rows % 8:
        # Keep sublane alignment for non-full blocks.
        block_rows = min(rows, ((block_rows + 7) // 8) * 8)

    total_blocks = -(-rows // block_rows)
    num_cores = min(_NUM_CORES, total_blocks)
    blocks_per_core = -(-total_blocks // num_cores)
    padded_blocks = num_cores * blocks_per_core

    full_blocks = rows // block_rows
    needs_mask_path = (rows % block_rows != 0) or (padded_blocks > total_blocks)

    if padded_blocks > total_blocks:
        # Overflow blocks from the core split: clamp the input block index so
        # the DMA stays in bounds; the kernel fully masks their contribution.
        def in_idx(c, i):
            return (jnp.minimum(c * blocks_per_core + i, total_blocks - 1), 0)
    else:
        def in_idx(c, i):
            return (c * blocks_per_core + i, 0)

    kernel = _make_kernel(
        t=t, eps=eps, clip_value=clip_value,
        lower_bound=1.0 - bound_ratio, up_bound=1.0 + bound_ratio,
        block_rows=block_rows, blocks_per_core=blocks_per_core,
        full_blocks=full_blocks, rows=rows, needs_mask_path=needs_mask_path,
    )

    lane_sums = pl.pallas_call(
        kernel,
        out_shape=jax.ShapeDtypeStruct((num_cores, _LANE), jnp.float32),
        grid_spec=pltpu.PrefetchScalarGridSpec(
            num_scalar_prefetch=0,
            grid=(num_cores, blocks_per_core),
            in_specs=[
                pl.BlockSpec((block_rows, _LANE), in_idx),
                pl.BlockSpec((block_rows, _LANE), in_idx),
            ],
            out_specs=pl.BlockSpec((1, _LANE), lambda c, i: (c, 0)),
        ),
        compiler_params=pltpu.CompilerParams(
            dimension_semantics=("parallel", "arbitrary"),
            vmem_limit_bytes=_VMEM_LIMIT_BYTES,
        ),
    )(pred2, targ2)

    # Analytic correction for the lane padding (pred=targ=0 -> both barriers hit
    # the linear branch at z=0, giving clip(2*const) per padded element).
    t_f = float(t)
    const = -math.log(1.0 / (t_f * t_f)) / t_f + 1.0 / t_f
    pad_res = min(max(2.0 * const, -float(clip_value)), float(clip_value))

    total_sum = jnp.sum(lane_sums) - jnp.float32(pad * pad_res)
    return total_sum / jnp.float32(total)


def _reference(predict, target, *, t=1.0, bound_ratio=0.1, eps=1e-4, clip_value=100.0):
    """Pure-JAX reference mirroring the PyTorch forward."""
    predict = jnp.asarray(predict, jnp.float32)
    target = jnp.asarray(target, jnp.float32)
    lower_bound = (1.0 - bound_ratio) * target
    upper_bound = (1.0 + bound_ratio) * target

    def get_loss(z):
        determine = z <= -1.0 / t ** 2
        left = jnp.where(determine, -jnp.log(jnp.abs(z) + eps) / t, 0.0)
        right = jnp.where(determine, 0.0,
                          t * z - math.log(1.0 / t ** 2) / t + 1.0 / t)
        return left + right

    res = get_loss(lower_bound - predict) + get_loss(predict - upper_bound)
    return jnp.mean(jnp.clip(res, -clip_value, clip_value))


def _make_inputs(key, shape):
    k_pred, k_targ = jax.random.split(key)
    predict = jax.nn.sigmoid(jax.random.normal(k_pred, shape, jnp.float32))
    target = jnp.abs(jax.random.normal(k_targ, shape, jnp.float32))
    return predict, target


if __name__ == "__main__":
    key = jax.random.PRNGKey(0)

    # Primary shape implied by the module docstring: [N, channel, volume],
    # volume = 16 * 16 flattened spatial positions.
    N, C, V = 2, 4, 16 * 16
    predict, target = _make_inputs(key, (N, C, V))
    loss = jax.block_until_ready(log_barrier_loss(predict, target))
    ref = _reference(predict, target)
    assert jnp.allclose(loss, ref, rtol=1e-4, atol=1e-5), (loss, ref)

    # Extra coverage of every code path:
    #  (a) numel % 128 != 0  -> lane-pad fallback + analytic correction.
    #  (b) multi-block, 2-core split, ragged last block + overflow block
    #      (small max_block_rows override exercises it at tiny sizes).
    #  (c) even 2-core split, no ragged, no overflow (pure fast path).
    #  (d) default block size with ragged last block at a realistic size.
    cases = [
        ((3, 5, 77), None),        # (a)
        ((2, 4, 16500), 256),      # (a) + (b)
        ((4, 4, 16 * 16), 8),      # (c)
        ((2, 4, 600000), None),    # (d)
    ]
    for shape, mbr in cases:
        key, sub = jax.random.split(key)
        p, g = _make_inputs(sub, shape)
        l = jax.block_until_ready(log_barrier_loss(p, g, max_block_rows=mbr))
        r = _reference(p, g)
        assert jnp.allclose(l, r, rtol=1e-4, atol=1e-4), (shape, mbr, l, r)

    print("KERNEL_OK")
</pallas_src>

<mosaic_0001>
module attributes {stable_mosaic.version = 11 : i64} {
  func.func @kernel(%arg0: i32, %arg1: i32, %arg2: memref<16x128xf32, #tpu.memory_space<vmem>>, %arg3: memref<16x128xf32, #tpu.memory_space<vmem>>, %arg4: memref<1x128xf32, #tpu.memory_space<vmem>>) attributes {dimension_semantics = [#tpu.dimension_semantics<parallel>, #tpu.dimension_semantics<arbitrary>], iteration_bounds = array<i64: 1, 1>, scalar_prefetch = 0 : i64, scratch_operands = 0 : i64, tpu.core_type = #tpu.core_type<tc>, window_params = [{transform_indices = @transform_0, window_bounds = array<i64: 16, 128>}, {transform_indices = @transform_1, window_bounds = array<i64: 16, 128>}, {transform_indices = @transform_2, window_bounds = array<i64: 1, 128>}]} {
    %c0_i32 = arith.constant 0 : i32
    %0 = arith.cmpi eq, %arg1, %c0_i32 : i32
    %1 = arith.extui %0 : i1 to i32
    %c0_i32_0 = arith.constant 0 : i32
    %2 = arith.cmpi ne, %1, %c0_i32_0 : i32
    scf.if %2 {
      %cst_22 = arith.constant 0.000000e+00 : f32
      %47 = vector.broadcast %cst_22 : f32 to vector<1x128xf32>
      %c0_23 = arith.constant 0 : index
      %c0_24 = arith.constant 0 : index
      %48 = vector.load %arg4[%c0_23, %c0_24] : memref<1x128xf32, #tpu.memory_space<vmem>>, vector<1x128xf32>
      tpu.vector_store %arg4[%c0_23, %c0_24], %47 {strides = array<i32>} : memref<1x128xf32, #tpu.memory_space<vmem>>, vector<1x128xf32>,
    } else {
    }
    %c0 = arith.constant 0 : index
    %c0_1 = arith.constant 0 : index
    %3 = vector.load %arg2[%c0, %c0_1] : memref<16x128xf32, #tpu.memory_space<vmem>>, vector<16x128xf32>
    %c0_2 = arith.constant 0 : index
    %c0_3 = arith.constant 0 : index
    %4 = vector.load %arg3[%c0_2, %c0_3] : memref<16x128xf32, #tpu.memory_space<vmem>>, vector<16x128xf32>
    %cst = arith.constant 0.899999976 : f32
    %5 = vector.broadcast %cst : f32 to vector<16x128xf32>
    %6 = arith.mulf %5, %4 : vector<16x128xf32>
    %7 = arith.subf %6, %3 : vector<16x128xf32>
    %cst_4 = arith.constant 1.100000e+00 : f32
    %8 = vector.broadcast %cst_4 : f32 to vector<16x128xf32>
    %9 = arith.mulf %8, %4 : vector<16x128xf32>
    %10 = arith.subf %3, %9 : vector<16x128xf32>
    %11 = math.absf %7 : vector<16x128xf32>
    %cst_5 = arith.constant 9.99999974E-5 : f32
    %12 = vector.broadcast %cst_5 : f32 to vector<16x128xf32>
    %13 = arith.addf %11, %12 : vector<16x128xf32>
    %14 = math.log %13 : vector<16x128xf32>
    %cst_6 = arith.constant -1.000000e+00 : f32
    %15 = vector.broadcast %cst_6 : f32 to vector<16x128xf32>
    %16 = arith.mulf %14, %15 : vector<16x128xf32>
    %cst_7 = arith.constant 1.000000e+00 : f32
    %17 = vector.broadcast %cst_7 : f32 to vector<16x128xf32>
    %18 = arith.mulf %17, %7 : vector<16x128xf32>
    %cst_8 = arith.constant 1.000000e+00 : f32
    %19 = vector.broadcast %cst_8 : f32 to vector<16x128xf32>
    %20 = arith.addf %18, %19 : vector<16x128xf32>
    %cst_9 = arith.constant -1.000000e+00 : f32
    %21 = vector.broadcast %cst_9 : f32 to vector<16x128xf32>
    %22 = arith.cmpf ole, %7, %21 : vector<16x128xf32>
    %23 = arith.select %22, %16, %20 : vector<16x128xi1>, vector<16x128xf32>
    %24 = math.absf %10 : vector<16x128xf32>
    %cst_10 = arith.constant 9.99999974E-5 : f32
    %25 = vector.broadcast %cst_10 : f32 to vector<16x128xf32>
    %26 = arith.addf %24, %25 : vector<16x128xf32>
    %27 = math.log %26 : vector<16x128xf32>
    %cst_11 = arith.constant -1.000000e+00 : f32
    %28 = vector.broadcast %cst_11 : f32 to vector<16x128xf32>
    %29 = arith.mulf %27, %28 : vector<16x128xf32>
    %cst_12 = arith.constant 1.000000e+00 : f32
    %30 = vector.broadcast %cst_12 : f32 to vector<16x128xf32>
    %31 = arith.mulf %30, %10 : vector<16x128xf32>
    %cst_13 = arith.constant 1.000000e+00 : f32
    %32 = vector.broadcast %cst_13 : f32 to vector<16x128xf32>
    %33 = arith.addf %31, %32 : vector<16x128xf32>
    %cst_14 = arith.constant -1.000000e+00 : f32
    %34 = vector.broadcast %cst_14 : f32 to vector<16x128xf32>
    %35 = arith.cmpf ole, %10, %34 : vector<16x128xf32>
    %36 = arith.select %35, %29, %33 : vector<16x128xi1>, vector<16x128xf32>
    %37 = arith.addf %23, %36 : vector<16x128xf32>
    %cst_15 = arith.constant -1.000000e+02 : f32
    %cst_16 = arith.constant 1.000000e+02 : f32
    %38 = vector.broadcast %cst_15 : f32 to vector<16x128xf32>
    %39 = arith.maximumf %38, %37 : vector<16x128xf32>
    %40 = vector.broadcast %cst_16 : f32 to vector<16x128xf32>
    %41 = arith.minimumf %40, %39 : vector<16x128xf32>
    %c0_17 = arith.constant 0 : index
    %c0_18 = arith.constant 0 : index
    %42 = vector.load %arg4[%c0_17, %c0_18] : memref<1x128xf32, #tpu.memory_space<vmem>>, vector<1x128xf32>
    %cst_19 = arith.constant dense<0.000000e+00> : vector<128xf32>
    %43 = vector.multi_reduction <add>, %41, %cst_19 [0] : vector<16x128xf32> to vector<128xf32>
    %44 = vector.shape_cast %43 : vector<128xf32> to vector<1x128xf32>
    %45 = arith.addf %42, %44 : vector<1x128xf32>
    %c0_20 = arith.constant 0 : index
    %c0_21 = arith.constant 0 : index
    %46 = vector.load %arg4[%c0_20, %c0_21] : memref<1x128xf32, #tpu.memory_space<vmem>>, vector<1x128xf32>
    tpu.vector_store %arg4[%c0_20, %c0_21], %45 {strides = array<i32>} : memref<1x128xf32, #tpu.memory_space<vmem>>, vector<1x128xf32>,
    return
  }
  func.func @transform_0(%arg0: i32, %arg1: i32) -> (i32, i32) {
    %c1_i32 = arith.constant 1 : i32
    %0 = arith.muli %arg0, %c1_i32 : i32
    %1 = arith.addi %0, %arg1 : i32
    %c0_i32 = arith.constant 0 : i32
    %c0_i32_0 = arith.constant 0 : i32
    return %1, %c0_i32 : i32, i32
  }
  func.func @transform_1(%arg0: i32, %arg1: i32) -> (i32, i32) {
    %c1_i32 = arith.constant 1 : i32
    %0 = arith.muli %arg0, %c1_i32 : i32
    %1 = arith.addi %0, %arg1 : i32
    %c0_i32 = arith.constant 0 : i32
    %c0_i32_0 = arith.constant 0 : i32
    return %1, %c0_i32 : i32, i32
  }
  func.func @transform_2(%arg0: i32, %arg1: i32) -> (i32, i32) {
    %c0_i32 = arith.constant 0 : i32
    %c0_i32_0 = arith.constant 0 : i32
    return %arg0, %c0_i32 : i32, i32
  }
}

</mosaic_0001>

<bundles_post_ra>
// kernel: tpu_custom_call.1
= control target key start
LH: loop header
LB: loop body
LE: loop exit
PB: predicated region body
PF: predicated region fallthrough
CT: control target
= control target key end

     0   :  { %7 = vsyncpa [#allocation3], 0  ;;  %s278_s0 = inlined_call_operand.hbm [shape: f32[16,128], index: 0, kind: input, shape index: {}]   ;;  %s279_s1 = inlined_call_operand.hbm [shape: f32[16,128], index: 1, kind: input, shape index: {}]   ;;  %s280_s2 = inlined_call_operand.hbm [shape: f32[1,128], index: 2, kind: output, shape index: {}]  }
   0x1   :  { %8 = vsyncpa [#allocation6], 0 }
   0x2   :  { %9 = vsyncpa [#allocation4], 0  ;;  %s221_s9 = smov [#allocation2]   ;;  %s149_s13 = scalar_lea.hbm %s278_s0, 256 }
   0x3   :  { %s19_s10 = sshll.u32 %s221_s9, 4  ;;  %p150_p0 = scmp.ne.s32.totalorder %s278_s0, %s149_s13  ;;  %s20_s10 = int_to_ptr.vmem [resolvable:$true] %s19_s10 }
   0x4   :  { %p153_p1 = scmp.lt.u32.totalorder %s149_s13, %s278_s0 }
   0x6   :  { %p155_p2 = pnand %p153_p1, %p150_p0 }
   0x8   :  { %158 = shalt.err (!%p155_p2)
}
   0x9   :  { %s159_s18 = scalar_lea.vmem %s20_s10, 256  ;;  %p164_p4 = scmp.lt.s32.totalorder %s20_s10, %s20_s10 }
   0xa   :  { %p160_p3 = scmp.ne.s32.totalorder %s20_s10, %s159_s18  ;;  %p165_p5 = scmp.lt.s32.totalorder %s159_s18, %s159_s18 }
   0xc   :  { %p166_p6 = por %p165_p5, %p164_p4 }
   0xe   :  { %p167_p7 = pnand %p166_p6, %p160_p3 }
  0x10   :  { %170 = shalt.err (!%p167_p7)
}
  0x11   :  { %s222_s19 = smov 128   ;;  %s223_s20 = smov 8  }
  0x12   :  { %25 = dma.hbm_to_vmem [thread:$0]  %s278_s0, 256, %s20_s10, [#allocation3], %s222_s19, %s222_s19, %s223_s20  }
  0x13   :  { %s224_s23 = smov [#allocation5]   ;;  %s171_s27 = scalar_lea.hbm %s279_s1, 256 }
  0x14   :  { %s35_s24 = sshll.u32 %s224_s23, 4  ;;  %p172_p8 = scmp.ne.s32.totalorder %s279_s1, %s171_s27  ;;  %s36_s24 = int_to_ptr.vmem [resolvable:$true] %s35_s24 }
  0x15   :  { %p175_p9 = scmp.lt.u32.totalorder %s171_s27, %s279_s1 }
  0x17   :  { %p177_p10 = pnand %p175_p9, %p172_p8 }
  0x19   :  { %180 = shalt.err (!%p177_p10)
}
  0x1a   :  { %s181_s4 = scalar_lea.vmem %s36_s24, 256  ;;  %p186_p12 = scmp.lt.s32.totalorder %s36_s24, %s36_s24 }
  0x1b   :  { %p182_p11 = scmp.ne.s32.totalorder %s36_s24, %s181_s4  ;;  %p187_p13 = scmp.lt.s32.totalorder %s181_s4, %s181_s4 }
  0x1d   :  { %p188_p0 = por %p187_p13, %p186_p12 }
  0x1f   :  { %p189_p1 = pnand %p188_p0, %p182_p11 }
  0x21   :  { %192 = shalt.err (!%p189_p1)
}
  0x22   :  { %41 = dma.hbm_to_vmem [thread:$0]  %s279_s1, 256, %s36_s24, [#allocation6], %s222_s19, %s222_s19, %s223_s20  }
  0x23   :  { %215 = dma.done.wait [#allocation3], 256  }
  0x24   :  { %216 = vsyncadd [#allocation3], 4294967040 }
  0x25   :  { %217 = dma.done.wait [#allocation6], 256  }
  0x26   :  { %218 = vsyncadd [#allocation6], 4294967040  ;;  %v225_v0 = vmov 0.0   ;;  %v57_v1 = vld [vmem:[#allocation2] sm:$0xff]  ;;  %v59_v2 = vld [vmem:[#allocation5] sm:$0xff]  ;;  %s226_s1 = smov [#allocation7]  }
  0x27   :  { %56 = vst [vmem:[#allocation7] sm:$0x1] %v225_v0  ;;  %v58_v3 = vld [vmem:[#allocation2 + $0x8] sm:$0xff]  ;;  %v60_v4 = vld [vmem:[#allocation5 + $0x8] sm:$0xff]  ;;  %v61_v5 = vmul.f32 0.9, %v59_v2 }
  0x28   :  { %v65_v6 = vmul.f32 1.1, %v59_v2  ;;  %v62_v7 = vmul.f32 0.9, %v60_v4  ;;  %v66_v8 = vmul.f32 1.1, %v60_v4 }
  0x29   :  { %v63_v9 = vsub.f32 %v61_v5, %v57_v1  ;;  %s123_s6 = sshll.u32 %s226_s1, 4  ;;  %s124_s6 = int_to_ptr.vmem [resolvable:$true] %s123_s6 }
  0x2a   :  { %v67_v10 = vsub.f32 %v57_v1, %v65_v6  ;;  %v64_v11 = vsub.f32 %v62_v7, %v58_v3  ;;  %v68_v12 = vsub.f32 %v58_v3, %v66_v8  ;;  %s193_s7 = scalar_lea.vmem %s124_s6, 16  ;;  %s197_s8 = scalar_lea.vmem %s124_s6, 32 }
  0x2b   :  { %v69_v13 = vand.u32 2147483647, %v63_v9  ;;  %v79_v24 = vadd.f32 1.0, %v63_v9  ;;  %vm81_vm0 = vcmp.le.f32.partialorder %v63_v9, -1.0  ;;  %p194_p2 = scmp.ne.s32.totalorder %s124_s6, %s193_s7  ;;  %p198_p3 = scmp.lt.s32.totalorder %s124_s6, %s124_s6 }
  0x2c   :  { %v85_v14 = vand.u32 2147483647, %v67_v10  ;;  %v70_v15 = vand.u32 2147483647, %v64_v11  ;;  %v86_v16 = vand.u32 2147483647, %v68_v12  ;;  %p199_p4 = scmp.lt.s32.totalorder %s197_s8, %s193_s7 }
  0x2d   :  { %v71_v17 = vadd.f32 0.0001, %v69_v13  ;;  %v80_v27 = vadd.f32 1.0, %v64_v11  ;;  %vm82_vm1 = vcmp.le.f32.partialorder %v64_v11, -1.0  ;;  %v95_v31 = vadd.f32 1.0, %v67_v10 }
  0x2e   :  { %v87_v18 = vadd.f32 0.0001, %v85_v14  ;;  %v72_v19 = vadd.f32 0.0001, %v70_v15  ;;  %v88_v20 = vadd.f32 0.0001, %v86_v16  ;;  %p200_p5 = por %p199_p4, %p198_p3 }
  0x2f   :  { %141 = vlog2.f32 %v71_v17  ;;  %v96_v34 = vadd.f32 1.0, %v68_v12  ;;  %vm97_vm2 = vcmp.le.f32.partialorder %v67_v10, -1.0  ;;  %vm98_vm3 = vcmp.le.f32.partialorder %v68_v12, -1.0  ;;  %v107_v51 = vld [vmem:[#allocation7] sm:$0x1] }
  0x30   :  { %143 = vlog2.f32 %v72_v19  ;;  %p201_p6 = pnand %p200_p5, %p194_p2 }
  0x31   :  { %145 = vlog2.f32 %v87_v18 }
  0x32   :  { %147 = vlog2.f32 %v88_v20 }
  0x39   :  { %v142_v21 = vpop.eup %141 }
  0x3a   :  { %v144_v22 = vpop.eup %143  ;;  %v74_v23 = vmul.f32 0.6931472, %v142_v21 }
  0x3b   :  { %v146_v25 = vpop.eup %145  ;;  %v76_v26 = vmul.f32 0.6931472, %v144_v22 }
  0x3c   :  { %v148_v28 = vpop.eup %147  ;;  %v77_v29 = vmul.f32 -1.0, %v74_v23  ;;  %v90_v30 = vmul.f32 0.6931472, %v146_v25 }
  0x3d   :  { %v78_v32 = vmul.f32 -1.0, %v76_v26  ;;  %v92_v33 = vmul.f32 0.6931472, %v148_v28 }
  0x3e   :  { %v83_v35 = vsel %vm81_vm0, %v77_v29, %v79_v24  ;;  %v93_v36 = vmul.f32 -1.0, %v90_v30 }
  0x3f   :  { %v84_v37 = vsel %vm82_vm1, %v78_v32, %v80_v27  ;;  %v94_v38 = vmul.f32 -1.0, %v92_v33 }
  0x40   :  { %v99_v39 = vsel %vm97_vm2, %v93_v36, %v95_v31 }
  0x41   :  { %v100_v40 = vsel %vm98_vm3, %v94_v38, %v96_v34  ;;  %v101_v41 = vadd.f32 %v99_v39, %v83_v35 }
  0x42   :  { %v102_v42 = vadd.f32 %v100_v40, %v84_v37 }
  0x43   :  { %v133_v43 = vclamps-f32 %v101_v41, 100.0 }
  0x44   :  { %v134_v44 = vclamps-f32 %v102_v42, 100.0 }
  0x46   :  { %v108_v45 = vadd.f32 %v134_v44, %v133_v43 }
  0x48   :  { %v109_v46 = vrot.slane %v108_v45, 4 }
  0x4a   :  { %v110_v47 = vadd.f32 %v109_v46, %v108_v45 }
  0x4c   :  { %v111_v48 = vrot.slane %v110_v47, 2 }
  0x4e   :  { %v112_v49 = vadd.f32 %v111_v48, %v110_v47 }
  0x50   :  { %v113_v50 = vrot.slane %v112_v49, 1 }
  0x52   :  { %v114_v52 = vadd.f32 %v113_v50, %v112_v49 }
  0x54   :  { %v115_v53 = vadd.f32 %v114_v52, %v107_v51 }
  0x56   :  { %116 = vst [vmem:[#allocation7] sm:$0x1] %v115_v53 }
  0x57   :  { %204 = shalt.err (!%p201_p6)
}
  0x58   :  { %s205_s11 = scalar_lea.hbm %s280_s2, 16 }
  0x59   :  { %p206_p7 = scmp.ne.s32.totalorder %s280_s2, %s205_s11  ;;  %p209_p8 = scmp.lt.u32.totalorder %s205_s11, %s280_s2 }
  0x5b   :  { %p211_p9 = pnand %p209_p8, %p206_p7 }
  0x5d   :  { %214 = shalt.err (!%p211_p9)
}
  0x5e   :  { %126 = dma.vmem_to_hbm [thread:$0]  %s124_s6, 16, %s280_s2, [#allocation4]  }
  0x5f   :  { %219 = dma.done.wait [#allocation4], 16  }
  0x60   :  { %220 = vsyncadd [#allocation4], 4294967280 }
  0x61   :  { %130 = vsyncpa [#allocation3], 1 }
  0x62   :  { %131 = vsyncpa [#allocation6], 1 }
  0x63   :  { %132 = vsyncpa [#allocation4], 1 }

</bundles_post_ra>
